<compile_context>
chip_gen: v7x
topology: tpu7x:2x2x1
jax: 0.10.0
libtpu: 0.0.40
codegen_flags: <defaults>
</compile_context>

<pallas_src>
import functools
import math

import jax
import jax.numpy as jnp
from jax.experimental import pallas as pl
from jax.experimental.pallas import tpu as pltpu


def _label_smoothing_kl_kernel(x_ref, tgt_ref, loss_ref, cnt_ref,
                               *, n_rows, tile_n, blocks_per_shard, total_blocks,
                               padding_idx, unk_idx, eps,
                               conf_minus_eps, ent_valid, ent_invalid):
    p = pl.program_id(0)
    j = pl.program_id(1)

    @pl.when(j == 0)
    def _():
        loss_ref[...] = jnp.zeros_like(loss_ref)
        cnt_ref[...] = jnp.zeros_like(cnt_ref)

    # Linear block index; steps past total_blocks are wasted (clamped DMA, skipped work).
    b_lin = p * blocks_per_shard + j

    @pl.when(b_lin < total_blocks)
    def _():
        x = x_ref[...].astype(jnp.float32)          # (tile_n, V) log-probabilities
        tgt = tgt_ref[...]                          # (tile_n, 1) int32 targets

        # Mask rows past the real end of the (unpadded) input.
        row0 = b_lin * tile_n
        local = jax.lax.broadcasted_iota(jnp.int32, (tile_n, 1), 0)
        in_range = (row0 + local) < n_rows          # (tile_n, 1) bool

        # Row sum of x (XLU) and the per-row pick x[row, tgt[row]].
        s_row = jnp.sum(x, axis=-1, keepdims=True)                        # (tile_n, 1)
        col = jax.lax.broadcasted_iota(jnp.int32, x.shape, 1)
        x_tgt = jnp.sum(jnp.where(col == tgt, x, 0.0), axis=-1, keepdims=True)
        x_pad = x_ref[:, padding_idx:padding_idx + 1].astype(jnp.float32)  # static lane slices
        x_unk = x_ref[:, unk_idx:unk_idx + 1].astype(jnp.float32)

        valid = in_range & (tgt != padding_idx) & (tgt != unk_idx)

        base = jnp.float32(eps) * (x_pad + x_unk - s_row)
        loss_valid = jnp.float32(ent_valid) - jnp.float32(conf_minus_eps) * x_tgt + base
        loss_invalid = jnp.float32(ent_invalid) + base
        loss_row = jnp.where(valid, loss_valid,
                             jnp.where(in_range, loss_invalid, jnp.float32(0.0)))

        loss_ref[...] += jnp.sum(loss_row)
        cnt_ref[...] += jnp.sum(valid.astype(jnp.float32))


def label_smoothing_loss(x, target, *, size, padding_idx, unk_idx,
                         smoothing=0.0, num_shards=2, max_tile_rows=2048,
                         vmem_limit_bytes=48 * 1024 * 1024):
    B, S, V = x.shape
    assert V == size
    assert padding_idx != unk_idx, "algebraic path assumes distinct pad/unk columns"
    N = B * S

    x2 = x.reshape(N, V)                          # keep input dtype (bf16 stays bf16)
    tgt2 = target.reshape(N, 1).astype(jnp.int32)

    # ---- tile sizing (dtype-aware sublane granularity, VMEM-budgeted) ----
    itemsize = jnp.dtype(x2.dtype).itemsize
    gran = max(8, 32 // itemsize)                 # 8 for f32, 16 for bf16, 32 for i8
    budget = vmem_limit_bytes // 2                # headroom for double-buffering + misc
    tile_n = max(gran, (budget // (2 * V * itemsize)) // gran * gran)
    tile_n = min(tile_n, max_tile_rows, -(-N // gran) * gran)

    total_blocks = -(-N // tile_n)
    num_shards = max(1, min(num_shards, total_blocks))
    blocks_per_shard = -(-total_blocks // num_shards)

    # ---- constant folding of the entropy terms (no in-kernel log) ----
    conf = 1.0 - smoothing
    eps = smoothing / (size - 2 + 1e-6)
    eps_log_eps = eps * math.log(eps) if eps > 0.0 else 0.0
    conf_log_conf = conf * math.log(conf) if conf > 0.0 else 0.0
    ent_valid = conf_log_conf + (size - 3) * eps_log_eps
    ent_invalid = (size - 2) * eps_log_eps

    kernel = functools.partial(
        _label_smoothing_kl_kernel,
        n_rows=N, tile_n=tile_n, blocks_per_shard=blocks_per_shard,
        total_blocks=total_blocks,
        padding_idx=padding_idx, unk_idx=unk_idx, eps=eps,
        conf_minus_eps=conf - eps, ent_valid=ent_valid, ent_invalid=ent_invalid)

    def row_block_map(p, j):
        # Clamp so out-of-range grid steps re-fetch the last real block (DMA is
        # then skipped for the repeated index); their compute is gated by pl.when.
        return (jnp.minimum(p * blocks_per_shard + j, total_blocks - 1), 0)

    loss_parts, cnt_parts = pl.pallas_call(
        kernel,
        out_shape=(jax.ShapeDtypeStruct((num_shards, 1, 1), jnp.float32),
                   jax.ShapeDtypeStruct((num_shards, 1, 1), jnp.float32)),
        grid_spec=pltpu.PrefetchScalarGridSpec(
            num_scalar_prefetch=0,
            grid=(num_shards, blocks_per_shard),
            in_specs=[
                pl.BlockSpec((tile_n, V), row_block_map),   # x tile
                pl.BlockSpec((tile_n, 1), row_block_map),   # target tile
            ],
            out_specs=[
                pl.BlockSpec((1, 1, 1), lambda p, j: (p, 0, 0)),   # per-shard loss sum
                pl.BlockSpec((1, 1, 1), lambda p, j: (p, 0, 0)),   # per-shard count
            ]),
        compiler_params=pltpu.CompilerParams(
            dimension_semantics=("parallel", "arbitrary"),
            vmem_limit_bytes=vmem_limit_bytes),
    )(x2, tgt2)

    # Final reduction + divide (glue, matches `/ num_non_pad_unk_elements.float()`).
    return jnp.sum(loss_parts) / jnp.sum(cnt_parts)


def _reference_loss(x, target, size, padding_idx, unk_idx, smoothing):
    confidence = 1.0 - smoothing
    eps = smoothing / (size - 2 + 1e-6)
    true_dist = jnp.full(x.shape, eps, dtype=jnp.float32)
    one_hot = jax.nn.one_hot(target, size, dtype=jnp.float32)
    true_dist = jnp.where(one_hot > 0, confidence, true_dist)
    true_dist = true_dist.at[:, :, padding_idx].set(0.0)
    true_dist = true_dist.at[:, :, unk_idx].set(0.0)
    kl = jnp.where(true_dist > 0,
                   true_dist * (jnp.log(jnp.maximum(true_dist, 1e-30)) - x),
                   0.0)
    num = jnp.sum((target != padding_idx) & (target != unk_idx)).astype(jnp.float32)
    return jnp.sum(kl) / num


if __name__ == "__main__":
    def run_case(case_id, B, S, V, padding_idx, unk_idx, smoothing, **kw):
        key = jax.random.fold_in(jax.random.PRNGKey(0), case_id)
        k1, k2 = jax.random.split(key)
        logits = jax.random.normal(k1, (B, S, V), dtype=jnp.float32)
        x = jax.nn.log_softmax(logits, axis=-1)              # log-probabilities
        target = jax.random.randint(k2, (B, S), 0, V, dtype=jnp.int32)
        # make sure some padding / unk targets exist
        target = target.at[0, 0].set(padding_idx)
        if S > 1:
            target = target.at[0, 1].set(unk_idx)
        loss = label_smoothing_loss(x, target, size=V, padding_idx=padding_idx,
                                    unk_idx=unk_idx, smoothing=smoothing, **kw)
        loss = jax.block_until_ready(loss)
        ref = _reference_loss(x, target, V, padding_idx, unk_idx, smoothing)
        assert jnp.allclose(loss, ref, rtol=1e-5, atol=1e-5), (case_id, loss, ref)

    # 1) exact tile fit (single block, single shard)
    run_case(0, 2, 8, 32, 0, 1, 0.1)
    # 2) N not a multiple of the sublane granularity -> in-kernel row masking
    run_case(1, 2, 7, 32, 0, 1, 0.1)
    # 3) multiple blocks + 2 shards + one clamped/skipped overshoot grid step
    run_case(2, 1, 17, 32, 2, 5, 0.2, max_tile_rows=8)

    print("KERNEL_OK")
</pallas_src>

<mosaic_0001>
module attributes {stable_mosaic.version = 11 : i64} {
  func.func @_label_smoothing_kl_kernel(%arg0: i32, %arg1: i32, %arg2: memref<16x32xf32, #tpu.memory_space<vmem>>, %arg3: memref<16x1xi32, #tpu.memory_space<vmem>>, %arg4: memref<1x1x1xf32, #tpu.memory_space<vmem>>, %arg5: memref<1x1x1xf32, #tpu.memory_space<vmem>>) attributes {dimension_semantics = [#tpu.dimension_semantics<parallel>, #tpu.dimension_semantics<arbitrary>], iteration_bounds = array<i64: 1, 1>, scalar_prefetch = 0 : i64, scratch_operands = 0 : i64, tpu.core_type = #tpu.core_type<tc>, window_params = [{transform_indices = @transform_0, window_bounds = array<i64: 16, 32>}, {transform_indices = @transform_1, window_bounds = array<i64: 16, 1>}, {transform_indices = @transform_2, window_bounds = array<i64: 1, 1, 1>}, {transform_indices = @transform_3, window_bounds = array<i64: 1, 1, 1>}]} {
    %c0_i32 = arith.constant 0 : i32
    %0 = arith.cmpi eq, %arg1, %c0_i32 : i32
    %1 = arith.extui %0 : i1 to i32
    %c0_i32_0 = arith.constant 0 : i32
    %2 = arith.cmpi ne, %1, %c0_i32_0 : i32
    scf.if %2 {
      %cst = arith.constant 0.000000e+00 : f32
      %8 = vector.broadcast %cst : f32 to vector<1x1x1xf32>
      %c0 = arith.constant 0 : index
      %c0_3 = arith.constant 0 : index
      %c0_4 = arith.constant 0 : index
      %9 = vector.load %arg4[%c0, %c0_3, %c0_4] : memref<1x1x1xf32, #tpu.memory_space<vmem>>, vector<1x1x1xf32>
      tpu.vector_store %arg4[%c0, %c0_3, %c0_4], %8 {strides = array<i32>} : memref<1x1x1xf32, #tpu.memory_space<vmem>>, vector<1x1x1xf32>,
      %cst_5 = arith.constant 0.000000e+00 : f32
      %10 = vector.broadcast %cst_5 : f32 to vector<1x1x1xf32>
      %c0_6 = arith.constant 0 : index
      %c0_7 = arith.constant 0 : index
      %c0_8 = arith.constant 0 : index
      %11 = vector.load %arg5[%c0_6, %c0_7, %c0_8] : memref<1x1x1xf32, #tpu.memory_space<vmem>>, vector<1x1x1xf32>
      tpu.vector_store %arg5[%c0_6, %c0_7, %c0_8], %10 {strides = array<i32>} : memref<1x1x1xf32, #tpu.memory_space<vmem>>, vector<1x1x1xf32>,
    } else {
    }
    %c1_i32 = arith.constant 1 : i32
    %3 = arith.muli %arg0, %c1_i32 : i32
    %4 = arith.addi %3, %arg1 : i32
    %c1_i32_1 = arith.constant 1 : i32
    %5 = arith.cmpi slt, %4, %c1_i32_1 : i32
    %6 = arith.extui %5 : i1 to i32
    %c0_i32_2 = arith.constant 0 : i32
    %7 = arith.cmpi ne, %6, %c0_i32_2 : i32
    scf.if %7 {
      %c0 = arith.constant 0 : index
      %c0_3 = arith.constant 0 : index
      %8 = vector.load %arg2[%c0, %c0_3] : memref<16x32xf32, #tpu.memory_space<vmem>>, vector<16x32xf32>
      %c0_4 = arith.constant 0 : index
      %c0_5 = arith.constant 0 : index
      %9 = vector.load %arg3[%c0_4, %c0_5] : memref<16x1xi32, #tpu.memory_space<vmem>>, vector<16x1xi32>
      %c16_i32 = arith.constant 16 : i32
      %10 = arith.muli %4, %c16_i32 : i32
      %11 = tpu.iota {dimensions = array<i32: 0>} : vector<16x1xi32>
      %12 = vector.broadcast %10 : i32 to vector<16x1xi32>
      %13 = arith.addi %12, %11 : vector<16x1xi32>
      %c16_i32_6 = arith.constant 16 : i32
      %14 = vector.broadcast %c16_i32_6 : i32 to vector<16x1xi32>
      %15 = arith.cmpi slt, %13, %14 : vector<16x1xi32>
      %cst = arith.constant dense<0.000000e+00> : vector<16xf32>
      %16 = vector.multi_reduction <add>, %8, %cst [1] : vector<16x32xf32> to vector<16xf32>
      %17 = vector.shape_cast %16 : vector<16xf32> to vector<16x1xf32>
      %18 = tpu.iota {dimensions = array<i32: 1>} : vector<16x32xi32>
      %19 = vector.broadcast %9 : vector<16x1xi32> to vector<16x32xi32>
      %20 = arith.cmpi eq, %18, %19 : vector<16x32xi32>
      %cst_7 = arith.constant 0.000000e+00 : f32
      %21 = vector.broadcast %cst_7 : f32 to vector<16x32xf32>
      %22 = arith.select %20, %8, %21 : vector<16x32xi1>, vector<16x32xf32>
      %cst_8 = arith.constant dense<0.000000e+00> : vector<16xf32>
      %23 = vector.multi_reduction <add>, %22, %cst_8 [1] : vector<16x32xf32> to vector<16xf32>
      %24 = vector.shape_cast %23 : vector<16xf32> to vector<16x1xf32>
      %c0_9 = arith.constant 0 : index
      %c0_10 = arith.constant 0 : index
      %25 = vector.load %arg2[%c0_9, %c0_10] : memref<16x32xf32, #tpu.memory_space<vmem>>, vector<16x1xf32>
      %c0_11 = arith.constant 0 : index
      %c1 = arith.constant 1 : index
      %26 = vector.load %arg2[%c0_11, %c1] : memref<16x32xf32, #tpu.memory_space<vmem>>, vector<16x1xf32>
      %c0_i32_12 = arith.constant 0 : i32
      %27 = vector.broadcast %c0_i32_12 : i32 to vector<16x1xi32>
      %28 = arith.cmpi ne, %9, %27 : vector<16x1xi32>
      %29 = arith.andi %15, %28 : vector<16x1xi1>
      %c1_i32_13 = arith.constant 1 : i32
      %30 = vector.broadcast %c1_i32_13 : i32 to vector<16x1xi32>
      %31 = arith.cmpi ne, %9, %30 : vector<16x1xi32>
      %32 = arith.andi %29, %31 : vector<16x1xi1>
      %33 = arith.addf %25, %26 : vector<16x1xf32>
      %34 = arith.subf %33, %17 : vector<16x1xf32>
      %cst_14 = arith.constant 0.00333333318 : f32
      %35 = vector.broadcast %cst_14 : f32 to vector<16x1xf32>
      %36 = arith.mulf %35, %34 : vector<16x1xf32>
      %cst_15 = arith.constant 0.896666646 : f32
      %37 = vector.broadcast %cst_15 : f32 to vector<16x1xf32>
      %38 = arith.mulf %37, %24 : vector<16x1xf32>
      %cst_16 = arith.constant -0.646190106 : f32
      %39 = vector.broadcast %cst_16 : f32 to vector<16x1xf32>
      %40 = arith.subf %39, %38 : vector<16x1xf32>
      %41 = arith.addf %40, %36 : vector<16x1xf32>
      %cst_17 = arith.constant -0.570378244 : f32
      %42 = vector.broadcast %cst_17 : f32 to vector<16x1xf32>
      %43 = arith.addf %42, %36 : vector<16x1xf32>
      %cst_18 = arith.constant 0.000000e+00 : f32
      %44 = vector.broadcast %cst_18 : f32 to vector<16x1xf32>
      %45 = arith.select %15, %43, %44 : vector<16x1xi1>, vector<16x1xf32>
      %46 = arith.select %32, %41, %45 : vector<16x1xi1>, vector<16x1xf32>
      %c0_19 = arith.constant 0 : index
      %c0_20 = arith.constant 0 : index
      %c0_21 = arith.constant 0 : index
      %47 = vector.load %arg4[%c0_19, %c0_20, %c0_21] : memref<1x1x1xf32, #tpu.memory_space<vmem>>, vector<1x1x1xf32>
      %48 = vector.shape_cast %46 : vector<16x1xf32> to vector<1x16x1xf32>
      %cst_22 = arith.constant dense<0.000000e+00> : vector<1xf32>
      %49 = vector.multi_reduction <add>, %48, %cst_22 [1, 2] : vector<1x16x1xf32> to vector<1xf32>
      %50 = vector.shape_cast %49 : vector<1xf32> to vector<1x1x1xf32>
      %51 = vector.extract %50[0, 0, 0] : f32 from vector<1x1x1xf32>
      %52 = vector.broadcast %51 : f32 to vector<1x1x1xf32>
      %53 = arith.addf %47, %52 : vector<1x1x1xf32>
      %c0_23 = arith.constant 0 : index
      %c0_24 = arith.constant 0 : index
      %c0_25 = arith.constant 0 : index
      %54 = vector.load %arg4[%c0_23, %c0_24, %c0_25] : memref<1x1x1xf32, #tpu.memory_space<vmem>>, vector<1x1x1xf32>
      tpu.vector_store %arg4[%c0_23, %c0_24, %c0_25], %53 {strides = array<i32>} : memref<1x1x1xf32, #tpu.memory_space<vmem>>, vector<1x1x1xf32>,
      %c0_26 = arith.constant 0 : index
      %c0_27 = arith.constant 0 : index
      %c0_28 = arith.constant 0 : index
      %55 = vector.load %arg5[%c0_26, %c0_27, %c0_28] : memref<1x1x1xf32, #tpu.memory_space<vmem>>, vector<1x1x1xf32>
      %56 = arith.extui %32 : vector<16x1xi1> to vector<16x1xi32>
      %57 = arith.sitofp %56 : vector<16x1xi32> to vector<16x1xf32>
      %58 = vector.shape_cast %57 : vector<16x1xf32> to vector<1x16x1xf32>
      %cst_29 = arith.constant dense<0.000000e+00> : vector<1xf32>
      %59 = vector.multi_reduction <add>, %58, %cst_29 [1, 2] : vector<1x16x1xf32> to vector<1xf32>
      %60 = vector.shape_cast %59 : vector<1xf32> to vector<1x1x1xf32>
      %61 = vector.extract %60[0, 0, 0] : f32 from vector<1x1x1xf32>
      %62 = vector.broadcast %61 : f32 to vector<1x1x1xf32>
      %63 = arith.addf %55, %62 : vector<1x1x1xf32>
      %c0_30 = arith.constant 0 : index
      %c0_31 = arith.constant 0 : index
      %c0_32 = arith.constant 0 : index
      %64 = vector.load %arg5[%c0_30, %c0_31, %c0_32] : memref<1x1x1xf32, #tpu.memory_space<vmem>>, vector<1x1x1xf32>
      tpu.vector_store %arg5[%c0_30, %c0_31, %c0_32], %63 {strides = array<i32>} : memref<1x1x1xf32, #tpu.memory_space<vmem>>, vector<1x1x1xf32>,
    } else {
    }
    return
  }
  func.func @transform_0(%arg0: i32, %arg1: i32) -> (i32, i32) {
    %c1_i32 = arith.constant 1 : i32
    %0 = arith.muli %arg0, %c1_i32 : i32
    %1 = arith.addi %0, %arg1 : i32
    %c0_i32 = arith.constant 0 : i32
    %2 = arith.minsi %1, %c0_i32 : i32
    %c0_i32_0 = arith.constant 0 : i32
    %c0_i32_1 = arith.constant 0 : i32
    return %2, %c0_i32_0 : i32, i32
  }
  func.func @transform_1(%arg0: i32, %arg1: i32) -> (i32, i32) {
    %c1_i32 = arith.constant 1 : i32
    %0 = arith.muli %arg0, %c1_i32 : i32
    %1 = arith.addi %0, %arg1 : i32
    %c0_i32 = arith.constant 0 : i32
    %2 = arith.minsi %1, %c0_i32 : i32
    %c0_i32_0 = arith.constant 0 : i32
    %c0_i32_1 = arith.constant 0 : i32
    return %2, %c0_i32_0 : i32, i32
  }
  func.func @transform_2(%arg0: i32, %arg1: i32) -> (i32, i32, i32) {
    %c0_i32 = arith.constant 0 : i32
    %c0_i32_0 = arith.constant 0 : i32
    %c0_i32_1 = arith.constant 0 : i32
    return %arg0, %c0_i32, %c0_i32_0 : i32, i32, i32
  }
  func.func @transform_3(%arg0: i32, %arg1: i32) -> (i32, i32, i32) {
    %c0_i32 = arith.constant 0 : i32
    %c0_i32_0 = arith.constant 0 : i32
    %c0_i32_1 = arith.constant 0 : i32
    return %arg0, %c0_i32, %c0_i32_0 : i32, i32, i32
  }
}

</mosaic_0001>

<bundles_post_ra>
// kernel: tpu_custom_call.1
= control target key start
LH: loop header
LB: loop body
LE: loop exit
PB: predicated region body
PF: predicated region fallthrough
CT: control target
= control target key end

     0   :  { %9 = vsyncpa [#allocation3], 0  ;;  %vm104_vm0 = vcmask 261120   ;;  %v301_v2 = vmov 0   ;;  %s398_s0 = inlined_call_operand.vmem [shape: f32[16,32], index: 0, kind: input, shape index: {}]   ;;  %s399_s1 = inlined_call_operand.vmem [shape: s32[16,1], index: 1, kind: input, shape index: {}]   ;;  %s400_s2 = inlined_call_operand.hbm [shape: f32[1,1,1], index: 2, kind: output, shape index: {0}]   ;;  %s401_s3 = inlined_call_operand.hbm [shape: f32[1,1,1], index: 3, kind: output, shape index: {1}]  }
   0x1   :  { %v93_v0 = vld [vmem:[%s399_s1] sm:$0xff]  ;;  %252 = vset.pattern.permute.xlu0 %v301_v2  ;;  %v92_v3 = vld [vmem:[%s398_s0 + $0x8] sm:$0xff] }
   0x2   :  { %v91_v1 = vld [vmem:[%s398_s0] sm:$0xff]  ;;  %114 = vperm.xlu0 %252, %v93_v0  }
   0x3   :  { %v105_v4 = vsel %vm104_vm0, %v91_v1, 0.0 }
   0x4   :  { %10 = vsyncpa [#allocation5], 0  ;;  %v94_v5 = vld [vmem:[%s399_s1 + $0x8] sm:$0xff]  ;;  %106 = vadd.xlane.f32.xlu1 %v105_v4  ;;  %v108_v6 = vsel %vm104_vm0, %v92_v3, 0.0  ;;  %s302_s20 = smov 127   ;;  %v111_v7 = vlaneseq  ;;  %vm129_vm3 = vcmp.ne.s32.totalorder %v93_v0, 0 }
   0x5   :  { %vm133_vm4 = vcmp.ne.s32.totalorder %v93_v0, 1  ;;  %vm130_vm5 = vcmp.ne.s32.totalorder %v94_v5, 0  ;;  %vm134_vm6 = vcmp.ne.s32.totalorder %v94_v5, 1  ;;  %vm164_vm9 = vcmask 7168   ;;  %s304_s0 = smov [#allocation2]   ;;  %s305_s22 = smov [#allocation4]  }
   0x6   :  { %117 = vperm.xlu0 %252, %v94_v5   ;;  %v112_v8 = vand.u32 127, %v111_v7  ;;  %vm342_vm7 = vmand %vm129_vm3, %vm133_vm4  ;;  %v303_v17 = vmov 0.0   ;;  %vm83_vm10 = vcmask 0   ;;  %s207_s1 = sshll.u32 %s304_s0, 4  ;;  %s217_s23 = sshll.u32 %s305_s22, 4  ;;  %s208_s1 = int_to_ptr.vmem [resolvable:$true] %s207_s1  ;;  %s364_s23 = int_to_ptr.vmem [resolvable:$true] %s217_s23 }
   0x7   :  { %vm346_vm8 = vmand %vm130_vm5, %vm134_vm6  ;;  %v241_v18 = vsel %vm342_vm7, 1.0, %v303_v17  ;;  %84 = vst.msk [vmem:[#allocation2] sm:$0x1] %vm83_vm10, %v303_v17  ;;  %s253_s25 = scalar_lea.vmem %s208_s1, 16  ;;  %s257_s26 = scalar_lea.vmem %s208_s1, 32 }
   0x8   :  { %109 = vadd.xlane.f32.xlu1 %v108_v6  ;;  %v242_v19 = vsel %vm346_vm8, 1.0, %v303_v17  ;;  %v186_v20 = vsel %vm164_vm9, %v241_v18, 0.0  ;;  %85 = vst.msk [vmem:[#allocation4] sm:$0x1] %vm83_vm10, %v303_v17  ;;  %p254_p0 = scmp.ne.s32.totalorder %s208_s1, %s253_s25  ;;  %p258_p1 = scmp.lt.s32.totalorder %s208_s1, %s208_s1 }
   0x9   :  { %v187_v21 = vsel %vm164_vm9, %v242_v19, 0.0  ;;  %p259_p2 = scmp.lt.s32.totalorder %s257_s26, %s253_s25 }
   0xa   :  { %v188_v22 = vadd.f32 %v187_v21, %v186_v20 }
   0xb   :  { %p260_p3 = por %p259_p2, %p258_p1 }
   0xd   :  { %p261_p4 = pnand %p260_p3, %p254_p0 }
   0xe   :  { %v163_v62 = vld [vmem:[#allocation2] sm:$0x1] }
   0xf   :  { %v181_v63 = vld [vmem:[#allocation4] sm:$0x1] }
  0x19   :  { %139 = vrot.lane.b32.xlu1 %v91_v1, %s302_s20 }
  0x81   :  { %v115_v9 = vpop.permute.xlu0 %114 }
  0x82   :  { %vm119_vm1 = vcmp.eq.s32.totalorder %v112_v8, %v115_v9 }
  0x83   :  { %v121_v10 = vsel %vm119_vm1, %v91_v1, 0.0 }
  0x84   :  { %v123_v11 = vsel %vm104_vm0, %v121_v10, 0.0 }
  0x85   :  { %v118_v12 = vpop.permute.xlu0 %117  ;;  %124 = vadd.xlane.f32.xlu0 %v123_v11 }
  0x86   :  { %vm120_vm2 = vcmp.eq.s32.totalorder %v112_v8, %v118_v12 }
  0x87   :  { %v122_v13 = vsel %vm120_vm2, %v92_v3, 0.0 }
  0x88   :  { %v126_v14 = vsel %vm104_vm0, %v122_v13, 0.0 }
  0x89   :  { %127 = vadd.xlane.f32.xlu1 %v126_v14  ;;  %189 = vadd.xlane.f32.xlu0 %v188_v22 }
  0x91   :  { %v107_v23 = vpop.xlane.xlu1 %106 }
  0x95   :  { %v110_v24 = vpop.xlane.xlu1 %109 }
  0x99   :  { %v140_v25 = vpop.permute.xlu1 %139 }
  0x9a   :  { %141 = vrot.lane.b32.xlu1 %v92_v3, %s302_s20  ;;  %v145_v27 = vadd.f32 %v140_v25, %v91_v1 }
  0x9c   :  { %v147_v30 = vsub.f32 %v145_v27, %v107_v23 }
  0x9e   :  { %v149_v33 = vmul.f32 0.0033333332, %v147_v30 }
  0xa0   :  { %v157_v38 = vadd.f32 -0.57037824, %v149_v33 }
 0x112   :  { %v125_v26 = vpop.xlane.xlu0 %124 }
 0x113   :  { %v151_v28 = vmul.f32 0.89666665, %v125_v26 }
 0x115   :  { %v153_v31 = vsub.f32 -0.6461901, %v151_v28 }
 0x116   :  { %v128_v29 = vpop.xlane.xlu1 %127  ;;  %v190_v48 = vpop.xlane.xlu0 %189 }
 0x117   :  { %v152_v34 = vmul.f32 0.89666665, %v128_v29  ;;  %v155_v36 = vadd.f32 %v153_v31, %v149_v33  ;;  %v191_v49 = vrot.slane %v190_v48, 4 }
 0x119   :  { %v154_v39 = vsub.f32 -0.6461901, %v152_v34  ;;  %v161_v43 = vsel %vm342_vm7, %v155_v36, %v157_v38  ;;  %v192_v50 = vadd.f32 %v191_v49, %v190_v48 }
 0x11a   :  { %v142_v32 = vpop.permute.xlu1 %141  ;;  %v165_v45 = vsel %vm164_vm9, %v161_v43, 0.0 }
 0x11b   :  { %v146_v35 = vadd.f32 %v142_v32, %v92_v3  ;;  %v193_v51 = vrot.slane %v192_v50, 2 }
 0x11d   :  { %v148_v37 = vsub.f32 %v146_v35, %v110_v24  ;;  %v194_v55 = vadd.f32 %v193_v51, %v192_v50 }
 0x11f   :  { %v150_v40 = vmul.f32 0.0033333332, %v148_v37  ;;  %v195_v58 = vrot.slane %v194_v55, 1 }
 0x121   :  { %v156_v41 = vadd.f32 %v154_v39, %v150_v40  ;;  %v158_v42 = vadd.f32 -0.57037824, %v150_v40  ;;  %v196_v61 = vadd.f32 %v195_v58, %v194_v55 }
 0x123   :  { %v162_v44 = vsel %vm346_vm8, %v156_v41, %v158_v42 }
 0x124   :  { %v166_v46 = vsel %vm164_vm9, %v162_v44, 0.0 }
 0x125   :  { %v167_v47 = vadd.f32 %v166_v46, %v165_v45 }
 0x127   :  { %168 = vadd.xlane.f32.xlu1 %v167_v47 }
 0x1b4   :  { %v169_v52 = vpop.xlane.xlu1 %168 }
 0x1b5   :  { %v170_v53 = vrot.slane %v169_v52, 4 }
 0x1b7   :  { %v171_v54 = vadd.f32 %v170_v53, %v169_v52 }
 0x1b9   :  { %v172_v56 = vrot.slane %v171_v54, 2 }
 0x1bb   :  { %v173_v57 = vadd.f32 %v172_v56, %v171_v54 }
 0x1bd   :  { %v174_v59 = vrot.slane %v173_v57, 1 }
 0x1bf   :  { %v175_v60 = vadd.f32 %v174_v59, %v173_v57 }
 0x1c1   :  { %243 = vpush %v175_v60 }
 0x1c2   :  { %245 = vpush %v196_v61 }
 0x1f2   :  { %s244_s21 = spop %243 }
 0x1f3   :  { %v177_v0 = vstv %s244_s21  ;;  %s246_s24 = spop %245 }
 0x1f4   :  { %v178_v1 = vadd.f32 %v177_v0, %v163_v62  ;;  %v198_v2 = vstv %s246_s24 }
 0x1f5   :  { %v199_v3 = vadd.f32 %v198_v2, %v181_v63 }
 0x1f6   :  { %180 = vst.msk [vmem:[#allocation2] sm:$0x1] %vm83_vm10, %v178_v1 }
 0x1f7   :  { %200 = vst.msk [vmem:[#allocation4] sm:$0x1] %vm83_vm10, %v199_v3 }
 0x1f8   :  { %264 = shalt.err (!%p261_p4)
}
 0x1f9   :  { %s265_s29 = scalar_lea.hbm %s400_s2, 16 }
 0x1fa   :  { %p266_p5 = scmp.ne.s32.totalorder %s400_s2, %s265_s29  ;;  %p269_p6 = scmp.lt.u32.totalorder %s265_s29, %s400_s2 }
 0x1fc   :  { %p271_p7 = pnand %p269_p6, %p266_p5 }
 0x1fe   :  { %274 = shalt.err (!%p271_p7)
}
 0x1ff   :  { %210 = dma.vmem_to_hbm [thread:$0]  %s208_s1, 16, %s400_s2, [#allocation3]  }
 0x200   :  { %s275_s9 = scalar_lea.vmem %s364_s23, 16  ;;  %s279_s10 = scalar_lea.vmem %s364_s23, 32 }
 0x201   :  { %p276_p8 = scmp.ne.s32.totalorder %s364_s23, %s275_s9  ;;  %p280_p9 = scmp.lt.s32.totalorder %s364_s23, %s364_s23 }
 0x202   :  { %p281_p10 = scmp.lt.s32.totalorder %s279_s10, %s275_s9 }
 0x204   :  { %p282_p11 = por %p281_p10, %p280_p9 }
 0x206   :  { %p283_p12 = pnand %p282_p11, %p276_p8 }
 0x208   :  { %286 = shalt.err (!%p283_p12)
}
 0x209   :  { %s287_s13 = scalar_lea.hbm %s401_s3, 16 }
 0x20a   :  { %p288_p13 = scmp.ne.s32.totalorder %s401_s3, %s287_s13  ;;  %p291_p0 = scmp.lt.u32.totalorder %s287_s13, %s401_s3 }
 0x20c   :  { %p293_p1 = pnand %p291_p0, %p288_p13 }
 0x20e   :  { %296 = shalt.err (!%p293_p1)
}
 0x20f   :  { %220 = dma.vmem_to_hbm [thread:$0]  %s364_s23, 16, %s401_s3, [#allocation5]  }
 0x210   :  { %297 = dma.done.wait [#allocation3], 16  }
 0x211   :  { %298 = vsyncadd [#allocation3], 4294967280 }
 0x212   :  { %299 = dma.done.wait [#allocation5], 16  }
 0x213   :  { %300 = vsyncadd [#allocation5], 4294967280 }
 0x214   :  { %227 = vsyncpa [#allocation3], 1 }
 0x215   :  { %228 = vsyncpa [#allocation5], 1 }

</bundles_post_ra>
